<compile_context>
chip_gen: v5e
topology: v5e:2x2
jax: 0.10.0
libtpu: 0.0.40
codegen_flags: <defaults>
</compile_context>

<pallas_src>
import jax
import jax.numpy as jnp
from jax.experimental import pallas as pl
from jax.experimental.pallas import tpu as pltpu


def _strokes_hbm_copy_kernel(src_hbm_ref, dst_hbm_ref, sem):
    # Stroke.forward() is an identity read of the parameter tensor: copy the
    # stacked parameters HBM -> HBM with one DMA descriptor (no VMEM staging).
    cp = pltpu.make_async_copy(src_hbm_ref, dst_hbm_ref, sem)
    cp.start()
    cp.wait()


def strokes_forward(stacked_strokes: jax.Array, *, materialize: bool = False) -> jax.Array:
    """Pallas equivalent of Strokes.forward().

    Args:
      stacked_strokes: [num_strokes, P, D] (or [num_strokes, ...]) array holding
        all stroke parameters (the stacked analogue of the ModuleList).
      materialize: if False (default), the op is a pure read-out and the input
        array is returned as-is — no kernel launch, no HBM traffic.  If True, a
        distinct HBM buffer is produced via a Pallas HBM->HBM DMA copy.

    Returns:
      Array with the same shape/dtype as `stacked_strokes`.  Use
      `unstack_strokes` for a per-Stroke Python list view.
    """
    if not materialize:
        # Forward pass is a parameter read-out: the identity needs no kernel.
        return stacked_strokes

    return pl.pallas_call(
        _strokes_hbm_copy_kernel,
        out_shape=jax.ShapeDtypeStruct(stacked_strokes.shape, stacked_strokes.dtype),
        in_specs=[pl.BlockSpec(memory_space=pl.ANY)],
        out_specs=pl.BlockSpec(memory_space=pl.ANY),
        scratch_shapes=[pltpu.SemaphoreType.DMA],
    )(stacked_strokes)


def unstack_strokes(stacked: jax.Array):
    """ModuleList-style view: one array per Stroke (kept off the hot path)."""
    return list(stacked)


def init_strokes(key, num_strokes: int, points_per_stroke: int, feat_dim: int):
    """Deterministic synthetic stroke parameters (stand-in for nn.Parameter init)."""
    return jax.random.normal(
        key, (num_strokes, points_per_stroke, feat_dim), dtype=jnp.float32
    )


if __name__ == "__main__":
    # Small shapes consistent with the module: 4 strokes, 8 control points each,
    # 32-dim per-point parameterization.
    NUM_STROKES = 4
    POINTS = 8
    FEAT = 32

    key = jax.random.PRNGKey(0)
    stacked = init_strokes(key, NUM_STROKES, POINTS, FEAT)

    # Default (fast) path: identity read-out, no kernel launched.
    out_view = strokes_forward(stacked)
    assert out_view is stacked

    # Materialized path: run the Pallas HBM->HBM DMA copy kernel once.
    out = strokes_forward(stacked, materialize=True)
    jax.block_until_ready(out)

    assert out.shape == stacked.shape
    assert out.dtype == stacked.dtype
    assert bool(jnp.array_equal(out, stacked))

    # ModuleList analogue (per-stroke view), checked for a couple strokes.
    stroke_list = unstack_strokes(out)
    assert len(stroke_list) == NUM_STROKES
    assert bool(jnp.array_equal(stroke_list[0], stacked[0]))
    assert bool(jnp.array_equal(stroke_list[-1], stacked[-1]))

    print("KERNEL_OK")
</pallas_src>

<mosaic_0001>
module attributes {stable_mosaic.version = 11 : i64} {
  func.func @_strokes_hbm_copy_kernel(%arg0: memref<4x8x32xf32, #tpu.memory_space<any>>, %arg1: memref<4x8x32xf32, #tpu.memory_space<any>>, %arg2: memref<!tpu.dma_semaphore, #tpu.memory_space<semaphore_mem>>) attributes {dimension_semantics = [], scalar_prefetch = 0 : i64, scratch_operands = 1 : i64, tpu.core_type = #tpu.core_type<tc>} {
    tpu.enqueue_dma source(%arg0 : memref<4x8x32xf32, #tpu.memory_space<any>>) target(%arg1 : memref<4x8x32xf32, #tpu.memory_space<any>>) target_semaphore(%arg2 : memref<!tpu.dma_semaphore, #tpu.memory_space<semaphore_mem>>)
    tpu.wait_dma2 semaphore(%arg2 : memref<!tpu.dma_semaphore, #tpu.memory_space<semaphore_mem>>) src(%arg0 : memref<4x8x32xf32, #tpu.memory_space<any>>) dst(%arg1 : memref<4x8x32xf32, #tpu.memory_space<any>>)
    return
  }
}

</mosaic_0001>

<bundles_post_ra>
// kernel: tpu_custom_call.1
= control target key start
LH: loop header
LB: loop body
LE: loop exit
PB: predicated region body
PF: predicated region fallthrough
CT: control target
= control target key end

     0   :  { %s33_s12 = smov [#allocation2]   ;;  %s34_s13 = smov [#allocation3]   ;;  %s52_s0 = inlined_call_operand.hbm [shape: f32[4,8,32], index: 0, kind: input, shape index: {}]   ;;  %s53_s1 = inlined_call_operand.hbm [shape: f32[4,8,32], index: 1, kind: output, shape index: {}]  }
   0x1   :  { %s10_s8 = sshll.u32 %s52_s0, 4  ;;  %s12_s11 = sshll.u32 %s53_s1, 4  ;;  %s11_s8 = int_to_ptr.hbm [resolvable:$true] %s10_s8  ;;  %s13_s11 = int_to_ptr.hbm [resolvable:$true] %s12_s11 }
   0x2   :  { %s35_s14 = smov 0  }
   0x3   :  { %16 = dma.general %s11_s8, 512, %s13_s11, %s33_s12, %s34_s13, [#allocation4], %s35_s14, 0  }
   0x4   :  { %31 = dma.done.wait [#allocation2], 512 }
   0x5   :  { %32 = vsyncadd [#allocation2], 4294966784 }
   0x6   :  { %21 = vsyncmov [#allocation2] }
   0x9   :  { %s22_s15 = vpop.sfrf %21 }
   0xa   :  { %p27_p0 = scmp.ne.s32.totalorder %s22_s15, 0 }
   0xc   :  { %26 = shalt.err (%p27_p0)  }

</bundles_post_ra>
